<compile_context>
chip_gen: v5e
topology: v5e:2x2
jax: 0.10.0
libtpu: 0.0.40
codegen_flags: <defaults>
</compile_context>

<pallas_src>
import jax
import jax.numpy as jnp
from jax import lax
from jax.experimental import pallas as pl
from jax.experimental.pallas import tpu as pltpu

_LANE = 128
_SUBLANE = 8
_NT_DIMS = (((1,), (1,)), ((), ()))  # contract last dims: lhs @ rhs^T


def _adv_net_kernel(x_ref, w1_ref, b1_ref, w2_ref, b2_ref, o_ref):
    # Layer 1: Linear(in_feature, 64) on the MXU with f32 accumulation.
    h = jnp.dot(x_ref[...], w1_ref[...], preferred_element_type=jnp.float32)
    h = h + b1_ref[...]                      # b1 broadcast over batch rows
    # LeakyReLU (PyTorch default negative_slope = 0.01).
    h = jnp.where(h > 0, h, 0.01 * h)
    # Dropout(0.5): identity in eval mode.
    # TODO(synk): training-mode dropout would need pltpu.prng_seed / prng_random_bits.
    # Layer 2: Linear(64, 1) as an NT matmul so the per-row logit is LANE-dense:
    #   [8, 64] @ [tile_b, 64]^T -> [8, tile_b]   (all 8 LHS rows are identical).
    yk = lax.dot_general(w2_ref[...], h, _NT_DIMS,
                         preferred_element_type=jnp.float32)
    y = yk[0:1, :] + b2_ref[0, 0]            # (1, tile_b), lane-dense logits
    # Sigmoid via tanh: one EUP transcendental, stable for large |y|.
    o_ref[0, :, :] = 0.5 + 0.5 * jnp.tanh(0.5 * y)


def _round_up(n, m):
    return ((n + m - 1) // m) * m


def _pick_tile_b(B, F):
    """Batch tile: big enough to amortize ~0.35us/step DMA+overhead, VMEM-safe."""
    if B <= 1024:
        return B                                   # single block (full dims are legal)
    f_pad = _round_up(F, _LANE)                    # x tile is lane-padded in VMEM
    # Weights are VMEM-resident (double-buffered) -> subtract from the budget.
    w_bytes = 2 * 4 * F * _LANE + 4 * 4 * _LANE
    budget = max(8 << 20, (40 << 20) - w_bytes)    # stay under the 48 MiB scoped limit
    # Lane-padding-aware per-batch-row VMEM bytes:
    #   2x double-buffered x tile, 2x (1,1,tile_b) out row (8-sublane pad),
    #   ~3 [tile_b,128] f32 intermediates (h, LeakyReLU(h), h^T for the NT matmul).
    per_row = 2 * 4 * f_pad + 2 * 4 * _SUBLANE + 3 * 4 * _LANE
    tile_b = budget // per_row
    # ~2 MiB of x HBM traffic per grid step is enough to hide per-step overhead.
    tile_b = min(tile_b, max((2 << 20) // (4 * F), 512))
    # At least two grid steps so both v7x TensorCores get work.
    tile_b = min(tile_b, _round_up(pl.cdiv(B, 2), 512))
    return max(512, (tile_b // 512) * 512)


def small_adversarial_network(x, w1, b1, w2, b2, *, tile_b=None):
    """Fused forward pass.

    x:  [B, F] float32
    w1: [F, 64], b1: [1, 64] (or [64]), w2: [64, 1], b2: [1, 1] (or [1])
    Returns [B, 1] float32 in (0, 1).
    """
    B, F = x.shape
    H = w1.shape[1]

    b1 = b1.reshape(1, H)
    b2 = b2.reshape(1, 1)
    # Replicate w2 across 8 sublanes so the NT matmul LHS is a full-sublane tile
    # (all rows identical; the kernel keeps row 0).  This costs nothing: a (1, H)
    # block is padded to 8 sublanes in VMEM anyway.
    w2_rep = jnp.broadcast_to(w2.reshape(1, H), (_SUBLANE, H))

    if tile_b is None:
        tile_b = _pick_tile_b(B, F)
    tile_b = int(min(tile_b, B))
    if tile_b < B:
        tile_b = max(_SUBLANE, (tile_b // _SUBLANE) * _SUBLANE)
    num_steps = pl.cdiv(B, tile_b)

    out3d = pl.pallas_call(
        _adv_net_kernel,
        out_shape=jax.ShapeDtypeStruct((num_steps, 1, tile_b), jnp.float32),
        grid=(num_steps,),
        in_specs=[
            pl.BlockSpec((tile_b, F), lambda i: (i, 0)),         # x: streamed, double-buffered
            pl.BlockSpec((F, H), lambda i: (0, 0)),              # w1: VMEM-resident
            pl.BlockSpec((1, H), lambda i: (0, 0)),              # b1: VMEM-resident
            pl.BlockSpec((_SUBLANE, H), lambda i: (0, 0)),       # w2 (replicated rows)
            pl.BlockSpec(memory_space=pltpu.MemorySpace.SMEM),   # b2: scalar in SMEM
        ],
        out_specs=pl.BlockSpec((1, 1, tile_b), lambda i: (i, 0, 0)),   # lane-dense row
        compiler_params=pltpu.CompilerParams(
            # Batch tiles are independent -> shard grid steps across TCs (v7x megacore).
            dimension_semantics=("parallel",),
            # Padding-aware working set stays <= ~40 MiB; raise scoped VMEM explicitly
            # (defaults: 16 MiB v5e / 32 MiB v6e / 32-of-64 MiB v7x).
            vmem_limit_bytes=48 * 1024 * 1024,
        ),
    )(x, w1, b1, w2_rep, b2)

    # (num_steps, 1, tile_b) row-major == batch order; drop the padded tail rows.
    return out3d.reshape(num_steps * tile_b)[:B].reshape(B, 1)


def init_params(key, in_feature, hidden=64):
    """Deterministic parameter init (Kaiming-uniform-like bounds, as in nn.Linear)."""
    k1, k2, k3, k4 = jax.random.split(key, 4)
    bound1 = 1.0 / jnp.sqrt(in_feature)
    bound2 = 1.0 / jnp.sqrt(hidden)
    w1 = jax.random.uniform(k1, (in_feature, hidden), jnp.float32, -bound1, bound1)
    b1 = jax.random.uniform(k2, (1, hidden), jnp.float32, -bound1, bound1)
    w2 = jax.random.uniform(k3, (hidden, 1), jnp.float32, -bound2, bound2)
    b2 = jax.random.uniform(k4, (1, 1), jnp.float32, -bound2, bound2)
    return w1, b1, w2, b2


def _reference(x, w1, b1, w2, b2):
    h = x @ w1 + b1
    h = jnp.where(h > 0, h, 0.01 * h)
    return jax.nn.sigmoid(h @ w2 + b2)


if __name__ == "__main__":
    IN_FEATURE = 32

    key = jax.random.PRNGKey(0)
    kx1, kx2, kp = jax.random.split(key, 3)
    w1, b1, w2, b2 = init_params(kp, IN_FEATURE)

    # 1) Small single-block case.
    x_small = jax.random.normal(kx1, (8, IN_FEATURE), dtype=jnp.float32)
    out_small = jax.block_until_ready(small_adversarial_network(x_small, w1, b1, w2, b2))
    assert out_small.shape == (8, 1)
    assert jnp.allclose(out_small, _reference(x_small, w1, b1, w2, b2),
                        atol=1e-3, rtol=1e-3)

    # 2) Multi-step grid (exercises the lane-dense (1, 1, tile_b) output path).
    x_big = jax.random.normal(kx2, (512, IN_FEATURE), dtype=jnp.float32)
    out_big = jax.block_until_ready(
        small_adversarial_network(x_big, w1, b1, w2, b2, tile_b=128))
    assert out_big.shape == (512, 1)
    assert jnp.allclose(out_big, _reference(x_big, w1, b1, w2, b2),
                        atol=1e-3, rtol=1e-3)

    print("KERNEL_OK")
</pallas_src>

<mosaic_0001>
module attributes {stable_mosaic.version = 11 : i64} {
  func.func @_adv_net_kernel(%arg0: i32, %arg1: memref<8x32xf32, #tpu.memory_space<vmem>>, %arg2: memref<32x64xf32, #tpu.memory_space<vmem>>, %arg3: memref<1x64xf32, #tpu.memory_space<vmem>>, %arg4: memref<8x64xf32, #tpu.memory_space<vmem>>, %arg5: memref<1x1xf32, #tpu.memory_space<smem>>, %arg6: memref<1x1x8xf32, #tpu.memory_space<vmem>>) attributes {dimension_semantics = [#tpu.dimension_semantics<parallel>], iteration_bounds = array<i64: 1>, scalar_prefetch = 0 : i64, scratch_operands = 0 : i64, tpu.core_type = #tpu.core_type<tc>, window_params = [{transform_indices = @transform_0, window_bounds = array<i64: 8, 32>}, {pipeline_mode = #tpu.pipeline_mode<synchronous>, transform_indices = @transform_1, window_bounds = array<i64: 32, 64>}, {pipeline_mode = #tpu.pipeline_mode<synchronous>, transform_indices = @transform_2, window_bounds = array<i64: 1, 64>}, {pipeline_mode = #tpu.pipeline_mode<synchronous>, transform_indices = @transform_3, window_bounds = array<i64: 8, 64>}, {transform_indices = @transform_4, window_bounds = array<i64: 1, 1>}, {transform_indices = @transform_5, window_bounds = array<i64: 1, 1, 8>}]} {
    %c0 = arith.constant 0 : index
    %c0_0 = arith.constant 0 : index
    %0 = vector.load %arg1[%c0, %c0_0] : memref<8x32xf32, #tpu.memory_space<vmem>>, vector<8x32xf32>
    %c0_1 = arith.constant 0 : index
    %c0_2 = arith.constant 0 : index
    %1 = vector.load %arg2[%c0_1, %c0_2] : memref<32x64xf32, #tpu.memory_space<vmem>>, vector<32x64xf32>
    %cst = arith.constant dense<0.000000e+00> : vector<8x64xf32>
    %2 = tpu.matmul %0, %1, %cst {dimension_numbers = #tpu.dot_dimension_numbers<[1], [0], [0], [1], [0, 0, 1, 1], [], []>} : vector<8x32xf32>, vector<32x64xf32>, vector<8x64xf32> -> vector<8x64xf32>
    %c0_3 = arith.constant 0 : index
    %c0_4 = arith.constant 0 : index
    %3 = vector.load %arg3[%c0_3, %c0_4] : memref<1x64xf32, #tpu.memory_space<vmem>>, vector<1x64xf32>
    %4 = vector.broadcast %3 : vector<1x64xf32> to vector<8x64xf32>
    %5 = arith.addf %2, %4 : vector<8x64xf32>
    %cst_5 = arith.constant 0.000000e+00 : f32
    %6 = vector.broadcast %cst_5 : f32 to vector<8x64xf32>
    %7 = arith.cmpf ogt, %5, %6 : vector<8x64xf32>
    %cst_6 = arith.constant 0.00999999977 : f32
    %8 = vector.broadcast %cst_6 : f32 to vector<8x64xf32>
    %9 = arith.mulf %8, %5 : vector<8x64xf32>
    %10 = arith.select %7, %5, %9 : vector<8x64xi1>, vector<8x64xf32>
    %c0_7 = arith.constant 0 : index
    %c0_8 = arith.constant 0 : index
    %11 = vector.load %arg4[%c0_7, %c0_8] : memref<8x64xf32, #tpu.memory_space<vmem>>, vector<8x64xf32>
    %cst_9 = arith.constant dense<0.000000e+00> : vector<8x8xf32>
    %12 = tpu.matmul %11, %10, %cst_9 {dimension_numbers = #tpu.dot_dimension_numbers<[1], [1], [0], [0], [0, 0, 1, 0], [], []>} : vector<8x64xf32>, vector<8x64xf32>, vector<8x8xf32> -> vector<8x8xf32>
    %13 = vector.extract_strided_slice %12 {offsets = [0, 0], sizes = [1, 8], strides = [1, 1]} : vector<8x8xf32> to vector<1x8xf32>
    %c0_10 = arith.constant 0 : index
    %c0_11 = arith.constant 0 : index
    %14 = memref.load %arg5[%c0_10, %c0_11] : memref<1x1xf32, #tpu.memory_space<smem>>
    %15 = vector.broadcast %14 : f32 to vector<1x8xf32>
    %16 = arith.addf %13, %15 : vector<1x8xf32>
    %cst_12 = arith.constant 5.000000e-01 : f32
    %17 = vector.broadcast %cst_12 : f32 to vector<1x8xf32>
    %18 = arith.mulf %17, %16 : vector<1x8xf32>
    %19 = math.tanh %18 : vector<1x8xf32>
    %cst_13 = arith.constant 5.000000e-01 : f32
    %20 = vector.broadcast %cst_13 : f32 to vector<1x8xf32>
    %21 = arith.mulf %20, %19 : vector<1x8xf32>
    %cst_14 = arith.constant 5.000000e-01 : f32
    %22 = vector.broadcast %cst_14 : f32 to vector<1x8xf32>
    %23 = arith.addf %22, %21 : vector<1x8xf32>
    %c0_15 = arith.constant 0 : index
    %c0_16 = arith.constant 0 : index
    %c0_17 = arith.constant 0 : index
    %24 = vector.load %arg6[%c0_15, %c0_16, %c0_17] : memref<1x1x8xf32, #tpu.memory_space<vmem>>, vector<1x1x8xf32>
    %25 = vector.shape_cast %24 : vector<1x1x8xf32> to vector<1x8xf32>
    %26 = vector.shape_cast %23 : vector<1x8xf32> to vector<1x1x8xf32>
    tpu.vector_store %arg6[%c0_15, %c0_16, %c0_17], %26 {strides = array<i32>} : memref<1x1x8xf32, #tpu.memory_space<vmem>>, vector<1x1x8xf32>,
    return
  }
  func.func @transform_0(%arg0: i32) -> (i32, i32) {
    %c0_i32 = arith.constant 0 : i32
    %c0_i32_0 = arith.constant 0 : i32
    return %arg0, %c0_i32 : i32, i32
  }
  func.func @transform_1(%arg0: i32) -> (i32, i32) {
    %c0_i32 = arith.constant 0 : i32
    %c0_i32_0 = arith.constant 0 : i32
    %c0_i32_1 = arith.constant 0 : i32
    return %c0_i32, %c0_i32_0 : i32, i32
  }
  func.func @transform_2(%arg0: i32) -> (i32, i32) {
    %c0_i32 = arith.constant 0 : i32
    %c0_i32_0 = arith.constant 0 : i32
    %c0_i32_1 = arith.constant 0 : i32
    return %c0_i32, %c0_i32_0 : i32, i32
  }
  func.func @transform_3(%arg0: i32) -> (i32, i32) {
    %c0_i32 = arith.constant 0 : i32
    %c0_i32_0 = arith.constant 0 : i32
    %c0_i32_1 = arith.constant 0 : i32
    return %c0_i32, %c0_i32_0 : i32, i32
  }
  func.func @transform_4(%arg0: i32) -> (i32, i32) {
    %c0_i32 = arith.constant 0 : i32
    %c0_i32_0 = arith.constant 0 : i32
    %c0_i32_1 = arith.constant 0 : i32
    return %c0_i32, %c0_i32_0 : i32, i32
  }
  func.func @transform_5(%arg0: i32) -> (i32, i32, i32) {
    %c0_i32 = arith.constant 0 : i32
    %c0_i32_0 = arith.constant 0 : i32
    %c0_i32_1 = arith.constant 0 : i32
    return %arg0, %c0_i32, %c0_i32_0 : i32, i32, i32
  }
}

</mosaic_0001>

<bundles_post_ra>
// kernel: tpu_custom_call.1
= control target key start
LH: loop header
LB: loop body
LE: loop exit
PB: predicated region body
PF: predicated region fallthrough
CT: control target
= control target key end

     0   :  { %11 = vsyncpa [#allocation4], 0  ;;  %s324_s0 = inlined_call_operand.hbm [shape: f32[8,32], index: 0, kind: input, shape index: {}]   ;;  %s325_s1 = inlined_call_operand.hbm [shape: f32[32,64], index: 1, kind: input, shape index: {}]   ;;  %s326_s2 = inlined_call_operand.vmem [shape: f32[1,64], index: 2, kind: input, shape index: {}]   ;;  %s327_s3 = inlined_call_operand.hbm [shape: f32[8,64], index: 3, kind: input, shape index: {}]   ;;  %s328_s4 = inlined_call_operand.<no memory space> [shape: f32[1,1], index: 4, kind: input, shape index: {}]   ;;  %s329_s5 = inlined_call_operand.hbm [shape: f32[1,1,8], index: 5, kind: output, shape index: {}]  }
   0x1   :  { %12 = vsyncpa [#allocation7], 0  ;;  %s29_s20 = sshll.u32 %s325_s1, 4  ;;  %s30_s20 = int_to_ptr.hbm [resolvable:$true] %s29_s20 }
   0x2   :  { %13 = vsyncpa [#allocation5], 0  ;;  %s270_s21 = smov [#allocation6]   ;;  %s19_s25 = sshll.u32 %s324_s0, 4  ;;  %s20_s25 = int_to_ptr.hbm [resolvable:$true] %s19_s25 }
   0x3   :  { %s31_s22 = sshll.u32 %s270_s21, 4  ;;  %s271_s26 = smov 128   ;;  %s32_s22 = int_to_ptr.vmem [resolvable:$true] %s31_s22 }
   0x4   :  { %s272_s27 = smov 8   ;;  %s273_s28 = smov [#allocation3]  }
   0x5   :  { %37 = dma.hbm_to_vmem [thread:$0]  %s30_s20, 512, %s32_s22, [#allocation7], %s271_s26, %s271_s26, %s272_s27  }
   0x6   :  { %s21_s29 = sshll.u32 %s273_s28, 4  ;;  %s45_s7 = sshll.u32 %s327_s3, 4  ;;  %s22_s29 = int_to_ptr.vmem [resolvable:$true] %s21_s29  ;;  %s46_s7 = int_to_ptr.hbm [resolvable:$true] %s45_s7 }
   0x7   :  { %24 = dma.hbm_to_vmem [thread:$0]  %s20_s25, 128, %s22_s29, [#allocation4]  }
   0x8   :  { %s274_s1 = smov [#allocation8]  }
   0x9   :  { %s47_s8 = sshll.u32 %s274_s1, 4  ;;  %s48_s8 = int_to_ptr.vmem [resolvable:$true] %s47_s8 }
   0xa   :  { %50 = dma.hbm_to_vmem [thread:$0]  %s46_s7, 128, %s48_s8, [#allocation7]  }
   0xb   :  { %264 = dma.done.wait [#allocation4], 128  }
   0xc   :  { %265 = vsyncadd [#allocation4], 4294967168 }
   0xd   :  { %266 = dma.done.wait [#allocation7], 640  }
   0xe   :  { %267 = vsyncadd [#allocation7], 4294966656  ;;  %v69_v0 = vld [vmem:[#allocation6 + $0x18] sm:$0xff]  ;;  %v68_v1 = vld [vmem:[#allocation6 + $0x10] sm:$0xff]  ;;  %vm74_vm0 = vcmask 261120   ;;  %vm102_vm2 = vcmask 523264   ;;  %v130_v11 = vstv %s328_s4 }
   0xf   :  { %90 = vmatpush.msra.mxu0 %v69_v0  ;;  %v67_v2 = vld [vmem:[#allocation6 + $0x8] sm:$0xff]  ;;  %v66_v3 = vld [vmem:[#allocation6] sm:$0xff]  ;;  %v65_v4 = vld [vmem:[#allocation3] sm:$0xff]  ;;  %s275_s11 = smov [#allocation9]   ;;  %s145_s14 = sshll.u32 %s329_s5, 4  ;;  %vm136_vm3 = vcmask 57344   ;;  %s146_s14 = int_to_ptr.hbm [resolvable:$true] %s145_s14 }
  0x10   :  { %v165_v5 = vld [vmem:[%s326_s2] ss:$0 sm:$0xff]  ;;  %v101_v10 = vld [vmem:[#allocation8] sm:$0xff]  ;;  %s143_s2 = sshll.u32 %s275_s11, 4  ;;  %s144_s2 = int_to_ptr.vmem [resolvable:$true] %s143_s2 }
  0x11   :  { %91 = vmatpush.msra.mxu0 %v68_v1 }
  0x13   :  { %92 = vmatpush.msra.mxu0 %v67_v2 }
  0x15   :  { %93 = vmatpush.msra.mxu0 %v66_v3 }
  0x16   :  { %156 = vmatmul.msk.f32.vlgmr.msra.gmra.mxu0 %vm74_vm0, %v65_v4 }
  0x93   :  { %v95_v6 = vpop.f32.mrf.mxu0 }
  0x94   :  { %v96_v7 = vadd.f32 %v165_v5, %v95_v6 }
  0x96   :  { %vm98_vm1 = vcmp.gt.f32.partialorder %v96_v7, 0.0  ;;  %v99_v8 = vmul.f32 0.01, %v96_v7 }
  0x98   :  { %v100_v9 = vsel %vm98_vm1, %v96_v7, %v99_v8 }
  0x99   :  { %157 = vmatpush.xpose.msk.msra.mxu1 %vm102_vm2, %v100_v9 }
  0x9c   :  { %158 = vmatmul.msk.f32.vlgmr.msra.gmra.mxu1 %vm102_vm2, %v101_v10 }
 0x119   :  { %v126_v12 = vpop.f32.mrf.mxu1 }
 0x11a   :  { %v131_v13 = vadd.f32 %v130_v11, %v126_v12 }
 0x11c   :  { %v132_v14 = vmul.f32 0.5, %v131_v13 }
 0x11e   :  { %166 = vtanh.f32 %v132_v14 }
 0x124   :  { %v167_v15 = vpop.eup %166 }
 0x125   :  { %v134_v16 = vmul.f32 0.5, %v167_v15 }
 0x127   :  { %v135_v17 = vadd.f32 0.5, %v134_v16 }
 0x129   :  { %137 = vst.msk [vmem:[#allocation9] sm:$0x1] %vm136_vm3, %v135_v17 }
 0x12a   :  { %148 = dma.vmem_to_hbm [thread:$0]  %s144_s2, 16, %s146_s14, [#allocation5]  }
 0x12b   :  { %268 = dma.done.wait [#allocation5], 16  }
 0x12c   :  { %269 = vsyncadd [#allocation5], 4294967280 }
 0x12d   :  { %153 = vsyncpa [#allocation4], 1 }
 0x12e   :  { %154 = vsyncpa [#allocation7], 1 }
 0x12f   :  { %155 = vsyncpa [#allocation5], 1 }

</bundles_post_ra>
